<compile_context>
chip_gen: v6e
topology: v6e:2x2x1
jax: 0.10.0
libtpu: 0.0.40
codegen_flags: <defaults>
</compile_context>

<pallas_src>
import jax
import jax.numpy as jnp
from jax.experimental import pallas as pl
from jax.experimental.pallas import tpu as pltpu


def _hsigmoid_kernel(x_ref, o_ref):
    x = x_ref[...]
    # relu6(x + 3) / 6 == clamp(x + 3, 0, 6) * (1/6); weak-typed constants
    # preserve the input dtype (f32 / bf16).  <=1 ulp vs true divide.
    y = jnp.clip(x + 3.0, 0.0, 6.0) * (1.0 / 6.0)
    o_ref[...] = y.astype(o_ref.dtype)


def _hsigmoid_jnp(x):
    return jnp.clip(x + 3.0, 0.0, 6.0) * (1.0 / 6.0)


_GEN_CONFIG = None


def _gen_config():
    """(block_bytes, vmem_limit_bytes) gated on this generation's VMEM size."""
    global _GEN_CONFIG
    if _GEN_CONFIG is None:
        try:
            cap = pltpu.get_tpu_info().vmem_capacity_bytes
        except Exception:
            cap = 64 * 1024 * 1024  # conservative (v7x-sized)
        if cap >= 96 * 1024 * 1024:
            # v5e / v6e: 128 MiB VMEM -> bigger blocks are free headroom.
            _GEN_CONFIG = (8 * 1024 * 1024, 64 * 1024 * 1024)
        else:
            # v7x: 64 MiB VMEM per TC -> 2x4 in + 2x4 out = 16 MiB live.
            _GEN_CONFIG = (4 * 1024 * 1024, 32 * 1024 * 1024)
    return _GEN_CONFIG


def hsigmoid(x: jax.Array, *, min_pallas_elems: int = 65536) -> jax.Array:
    """Elementwise hard-sigmoid. Accepts any shape (e.g. NCHW)."""
    orig_shape = x.shape
    orig_dtype = x.dtype
    n = x.size
    if n == 0:
        return x
    if not jnp.issubdtype(orig_dtype, jnp.floating):
        # TODO(synk): integer inputs are not meaningful for Hsigmoid; compute in f32.
        return _hsigmoid_jnp(x.astype(jnp.float32)).astype(orig_dtype)

    # KB-scale tensors: pallas_call launch/DMA overhead dwarfs the work and
    # XLA will fuse the jnp version into neighbours for free.
    if n < min_pallas_elems:
        return _hsigmoid_jnp(x)

    block_bytes, vmem_limit = _gen_config()
    lane = 128
    itemsize = jnp.dtype(orig_dtype).itemsize

    x_flat = jnp.ravel(x)
    n_main = (n // lane) * lane
    tail = n - n_main

    if n_main == 0:
        # Degenerate (only possible with a tiny min_pallas_elems override).
        return _hsigmoid_jnp(x)

    rows = n_main // lane
    row_bytes = lane * itemsize
    # Largest tile within the per-generation block budget; multiple of 32 rows
    # satisfies native (8,128) tiling for f32 / bf16 / int8 alike.
    max_tile_rows = max(32, (block_bytes // row_bytes) // 32 * 32)

    if rows <= max_tile_rows:
        if rows * row_bytes > (2 << 20):
            # Medium tensor: force >= ~4 grid steps so both v7x TensorCores
            # get work and DMA/compute overlap across steps.
            tile_rows = -(-(-(-rows // 4)) // 32) * 32
            tile_rows = min(tile_rows, max_tile_rows)
        else:
            tile_rows = rows  # single full-extent block (always layout-legal)
    else:
        tile_rows = max_tile_rows

    grid = (pl.cdiv(rows, tile_rows),)  # masked partial last block is fine

    x2d = x_flat[:n_main].reshape(rows, lane)

    out2d = pl.pallas_call(
        _hsigmoid_kernel,
        out_shape=jax.ShapeDtypeStruct((rows, lane), orig_dtype),
        grid_spec=pl.GridSpec(
            grid=grid,
            in_specs=[pl.BlockSpec((tile_rows, lane), lambda i: (i, 0))],
            out_specs=pl.BlockSpec((tile_rows, lane), lambda i: (i, 0)),
        ),
        compiler_params=pltpu.CompilerParams(
            dimension_semantics=("parallel",),
            vmem_limit_bytes=vmem_limit,
        ),
    )(x2d)

    out_flat = out2d.reshape(-1)
    if tail:
        # Tiny (< 128 elem) tail handled with plain jnp -- no pad, no slice of
        # the full tensor.
        tail_y = _hsigmoid_jnp(x_flat[n_main:])
        out_flat = jnp.concatenate([out_flat, tail_y])
    return out_flat.reshape(orig_shape)


def _hsigmoid_ref(x):
    return jnp.clip(x + 3.0, 0.0, 6.0) / 6.0


if __name__ == "__main__":
    key = jax.random.PRNGKey(0)
    k0, k1, k2 = jax.random.split(key, 3)

    # 1) NCHW activation-style input; force the Pallas path (single
    #    full-extent block) even though it's below the small-input cutoff.
    x1 = jax.random.normal(k0, (2, 4, 16, 16), dtype=jnp.float32) * 4.0
    y1 = jax.block_until_ready(hsigmoid(x1, min_pallas_elems=0))
    assert y1.shape == x1.shape and y1.dtype == x1.dtype
    assert jnp.allclose(y1, _hsigmoid_ref(x1), atol=1e-6, rtol=1e-6)

    # 2) Awkward size (3*5*7*11 = 1155): lane-aligned main part through the
    #    kernel + 3-element jnp tail (no pad / no slice).
    x2 = jax.random.normal(k1, (3, 5, 7, 11), dtype=jnp.float32) * 4.0
    y2 = jax.block_until_ready(hsigmoid(x2, min_pallas_elems=0))
    assert y2.shape == x2.shape and y2.dtype == x2.dtype
    assert jnp.allclose(y2, _hsigmoid_ref(x2), atol=1e-6, rtol=1e-6)

    # 3) Medium tensor (4 MiB): multi-step "parallel" grid so megacore (v7x)
    #    sharding and cross-step DMA/compute overlap are exercised.
    x3 = jax.random.normal(k2, (64, 64, 256), dtype=jnp.float32) * 4.0
    y3 = jax.block_until_ready(hsigmoid(x3))
    assert y3.shape == x3.shape and y3.dtype == x3.dtype
    assert jnp.allclose(y3, _hsigmoid_ref(x3), atol=1e-6, rtol=1e-6)

    # 4) Default small-input fallback path (pure jnp).
    y4 = jax.block_until_ready(hsigmoid(x1))
    assert jnp.allclose(y4, _hsigmoid_ref(x1), atol=1e-6, rtol=1e-6)

    print("KERNEL_OK")
</pallas_src>

<mosaic_0001>
module attributes {stable_mosaic.version = 11 : i64} {
  func.func @_hsigmoid_kernel(%arg0: i32, %arg1: memref<16x128xf32, #tpu.memory_space<vmem>>, %arg2: memref<16x128xf32, #tpu.memory_space<vmem>>) attributes {dimension_semantics = [#tpu.dimension_semantics<parallel>], iteration_bounds = array<i64: 1>, scalar_prefetch = 0 : i64, scratch_operands = 0 : i64, tpu.core_type = #tpu.core_type<tc>, window_params = [{transform_indices = @transform_0, window_bounds = array<i64: 16, 128>}, {transform_indices = @transform_1, window_bounds = array<i64: 16, 128>}]} {
    %c0 = arith.constant 0 : index
    %c0_0 = arith.constant 0 : index
    %0 = vector.load %arg1[%c0, %c0_0] : memref<16x128xf32, #tpu.memory_space<vmem>>, vector<16x128xf32>
    %cst = arith.constant 3.000000e+00 : f32
    %1 = vector.broadcast %cst : f32 to vector<16x128xf32>
    %2 = arith.addf %0, %1 : vector<16x128xf32>
    %cst_1 = arith.constant 0.000000e+00 : f32
    %cst_2 = arith.constant 6.000000e+00 : f32
    %3 = vector.broadcast %cst_1 : f32 to vector<16x128xf32>
    %4 = arith.maximumf %3, %2 : vector<16x128xf32>
    %5 = vector.broadcast %cst_2 : f32 to vector<16x128xf32>
    %6 = arith.minimumf %5, %4 : vector<16x128xf32>
    %cst_3 = arith.constant 0.166666672 : f32
    %7 = vector.broadcast %cst_3 : f32 to vector<16x128xf32>
    %8 = arith.mulf %6, %7 : vector<16x128xf32>
    %c0_4 = arith.constant 0 : index
    %c0_5 = arith.constant 0 : index
    %9 = vector.load %arg2[%c0_4, %c0_5] : memref<16x128xf32, #tpu.memory_space<vmem>>, vector<16x128xf32>
    tpu.vector_store %arg2[%c0_4, %c0_5], %8 {strides = array<i32>} : memref<16x128xf32, #tpu.memory_space<vmem>>, vector<16x128xf32>,
    return
  }
  func.func @transform_0(%arg0: i32) -> (i32, i32) {
    %c0_i32 = arith.constant 0 : i32
    %c0_i32_0 = arith.constant 0 : i32
    return %arg0, %c0_i32 : i32, i32
  }
  func.func @transform_1(%arg0: i32) -> (i32, i32) {
    %c0_i32 = arith.constant 0 : i32
    %c0_i32_0 = arith.constant 0 : i32
    return %arg0, %c0_i32 : i32, i32
  }
}

</mosaic_0001>

<bundles_post_ra>
// kernel: tpu_custom_call.1
= control target key start
LH: loop header
LB: loop body
LE: loop exit
PB: predicated region body
PF: predicated region fallthrough
CT: control target
= control target key end

     0   :  { %6 = vsyncpa [#allocation3], 0  ;;  %s126_s0 = inlined_call_operand.hbm [shape: f32[16,128], index: 0, kind: input, shape index: {}]   ;;  %s127_s1 = inlined_call_operand.hbm [shape: f32[16,128], index: 1, kind: output, shape index: {}]  }
   0x1   :  { %7 = vsyncpa [#allocation4], 0  ;;  %s100_s6 = smov [#allocation2]  }
   0x2   :  { %s13_s7 = sshll.u32 %s100_s6, 4  ;;  %s14_s7 = int_to_ptr.vmem [resolvable:$true] %s13_s7 }
   0x3   :  { %s64_s8 = scalar_lea.vmem %s14_s7, 256  ;;  %p69_p1 = scmp.lt.s32.totalorder %s14_s7, %s14_s7 }
   0x4   :  { %p65_p0 = scmp.ne.s32.totalorder %s14_s7, %s64_s8  ;;  %p70_p2 = scmp.lt.s32.totalorder %s64_s8, %s64_s8 }
   0x6   :  { %p71_p3 = por %p70_p2, %p69_p1 }
   0x8   :  { %p72_p4 = pnand %p71_p3, %p65_p0 }
   0xa   :  { %75 = shalt.err (!%p72_p4)
}
   0xb   :  { %s101_s9 = smov 128   ;;  %s102_s10 = smov 8  }
   0xc   :  { %19 = dma.hbm_to_vmem [thread:$0]  %s126_s0, 256, %s14_s7, [#allocation3], %s101_s9, %s101_s9, %s102_s10  }
   0xd   :  { %96 = dma.done.wait [#allocation3], 256  }
   0xe   :  { %97 = vsyncadd [#allocation3], 4294967040  ;;  %v23_v0 = vld [vmem:[#allocation2] sm:$0xff]  ;;  %v24_v1 = vld [vmem:[#allocation2 + $0x8] sm:$0xff]  ;;  %s103_s13 = smov [#allocation5]  }
   0xf   :  { %v25_v2 = vadd.f32 3.0, %v23_v0  ;;  %v26_v3 = vadd.f32 3.0, %v24_v1  ;;  %s40_s14 = sshll.u32 %s103_s13, 4  ;;  %s41_s14 = int_to_ptr.vmem [resolvable:$true] %s40_s14 }
  0x10   :  { %s76_s15 = scalar_lea.vmem %s41_s14, 256  ;;  %p81_p6 = scmp.lt.s32.totalorder %s41_s14, %s41_s14 }
  0x11   :  { %v27_v4 = vmax.f32 %v25_v2, 0.0  ;;  %v28_v5 = vmax.f32 %v26_v3, 0.0  ;;  %p77_p5 = scmp.ne.s32.totalorder %s41_s14, %s76_s15  ;;  %p82_p7 = scmp.lt.s32.totalorder %s76_s15, %s76_s15 }
  0x13   :  { %v29_v6 = vmin.f32 %v27_v4, 6.0  ;;  %v30_v7 = vmin.f32 %v28_v5, 6.0  ;;  %p83_p8 = por %p82_p7, %p81_p6 }
  0x15   :  { %v31_v8 = vmul.f32 0.16666667, %v29_v6  ;;  %v32_v9 = vmul.f32 0.16666667, %v30_v7  ;;  %p84_p9 = pnand %p83_p8, %p77_p5 }
  0x17   :  { %33 = vst [vmem:[#allocation5] sm:$0xff] %v31_v8  ;;  %34 = vst [vmem:[#allocation5 + $0x8] sm:$0xff] %v32_v9 }
  0x18   :  { %87 = shalt.err (!%p84_p9)
}
  0x19   :  { %46 = dma.vmem_to_hbm [thread:$0]  %s41_s14, 256, %s127_s1, [#allocation4], %s101_s9, %s101_s9, %s102_s10  }
  0x1a   :  { %98 = dma.done.wait [#allocation4], 256  }
  0x1b   :  { %99 = vsyncadd [#allocation4], 4294967040 }
  0x1c   :  { %50 = vsyncpa [#allocation3], 1 }
  0x1d   :  { %51 = vsyncpa [#allocation4], 1 }

</bundles_post_ra>
